<compile_context>
chip_gen: v7x
topology: tpu7x:2x2x1
jax: 0.10.0
libtpu: 0.0.40
codegen_flags: <defaults>
</compile_context>

<pallas_src>
import functools

import jax
import jax.numpy as jnp
from jax.experimental import pallas as pl
from jax.experimental.pallas import tpu as pltpu


def _fastrcnn_loss_kernel(n_ref, logits_ref, boxreg_ref, side_ref, out_ref):
    """One row-tile; accumulates (ce_sum, box_sum) into a resident (8,128) block."""
    pid = pl.program_id(0)
    n_valid = n_ref[0]

    logits = logits_ref[...].astype(jnp.float32)     # [TN, C]
    boxreg = boxreg_ref[...].astype(jnp.float32)     # [TN, 4C]
    side = side_ref[...]                             # [TN, 8] f32
    labels = side[:, 0:1].astype(jnp.int32)          # [TN, 1]
    tgt = side[:, 1:5]                               # [TN, 4]

    tn, c = logits.shape

    # Row-validity mask for the (possibly ragged / unpadded) last tile.
    row_ids = pid * tn + jax.lax.broadcasted_iota(jnp.int32, (tn, 1), 0)
    row_valid = row_ids < n_valid                    # [TN, 1] bool

    # ---- cross entropy partial sum (single pass over [TN, C]) ----
    m = jnp.max(logits, axis=-1, keepdims=True)
    shifted = logits - m
    lse = jnp.log(jnp.sum(jnp.exp(shifted), axis=-1, keepdims=True))      # [TN,1]
    class_ids = jax.lax.broadcasted_iota(jnp.int32, (tn, c), 1)
    picked = jnp.sum(jnp.where(class_ids == labels, shifted, 0.0),
                     axis=-1, keepdims=True)                              # [TN,1]
    ce_sum = jnp.sum(jnp.where(row_valid, lse - picked, 0.0))

    # ---- smooth-L1 box loss: masked lane-reduce gather, SL1 on [TN,1]x4 ----
    pos = (labels > 0) & row_valid                   # [TN, 1]
    col_ids = jax.lax.broadcasted_iota(jnp.int32, (tn, 4 * c), 1)
    quad_ids = col_ids >> 2                          # class index of each column
    comp_ids = col_ids & 3                           # box-component index (0..3)
    sel = (quad_ids == labels) & pos                 # [TN, 4C]
    masked_box = jnp.where(sel, boxreg, 0.0)         # single select on the slab

    box_sum = jnp.float32(0.0)
    for k in range(4):
        # constant comp-id mask -> masked lane reduction (XLU) = the gather
        gk = jnp.sum(jnp.where(comp_ids == k, masked_box, 0.0),
                     axis=-1, keepdims=True)         # [TN, 1]
        d = gk - tgt[:, k:k + 1]
        ad = jnp.abs(d)
        sl1 = jnp.where(ad < 1.0, 0.5 * d * d, ad - 0.5)
        box_sum = box_sum + jnp.sum(jnp.where(pos, sl1, 0.0))

    # ---- accumulate into the resident lane-dense output block ----
    lane = jax.lax.broadcasted_iota(jnp.int32, (8, 128), 1)
    tile_partial = jnp.where(lane == 0, ce_sum,
                             jnp.where(lane == 1, box_sum, 0.0))

    @pl.when(pid == 0)
    def _():
        out_ref[...] = jnp.zeros_like(out_ref)

    out_ref[...] += tile_partial


def fastrcnn_loss(class_logits, box_regression, labels, regression_targets,
                  *, tile_n=1024):
    """class_logits [N,C] (f32/bf16), box_regression [N,4C] (f32/bf16),
    labels [N] int, regression_targets [N,4] f32 -> (cls_loss, box_loss)."""
    n, c = class_logits.shape
    assert box_regression.shape == (n, 4 * c)

    if n == 0:
        # Degenerate case (no proposals): nothing to average over.
        z = jnp.float32(0.0)
        return z, z

    # No padding of the big arrays: ragged last block + in-kernel row mask.
    if n <= tile_n:
        tn = n                       # single tile, block == full array dim
    else:
        tn = max(8, (tile_n // 8) * 8)
    g = -(-n // tn)

    # Pack the tiny per-row side data into one [N, 8] block (label, 4 targets,
    # zero pad) -> one narrow DMA per tile instead of two.
    side = jnp.concatenate(
        [labels.astype(jnp.float32)[:, None],
         regression_targets.astype(jnp.float32),
         jnp.zeros((n, 3), jnp.float32)], axis=-1)

    n_scalar = jnp.array([n], dtype=jnp.int32)       # scalar-prefetch SMEM arg

    in_bytes = (class_logits.size * class_logits.dtype.itemsize
                + box_regression.size * box_regression.dtype.itemsize
                + side.size * 4 + 4)
    cost = pl.CostEstimate(
        flops=12 * n * 4 * c + 8 * n * c,
        transcendentals=n * c,
        bytes_accessed=in_bytes + 8 * 128 * 4)

    out = pl.pallas_call(
        _fastrcnn_loss_kernel,
        out_shape=jax.ShapeDtypeStruct((8, 128), jnp.float32),
        grid_spec=pltpu.PrefetchScalarGridSpec(
            num_scalar_prefetch=1,
            grid=(g,),
            in_specs=[
                pl.BlockSpec((tn, c), lambda i, n_ref: (i, 0)),
                pl.BlockSpec((tn, 4 * c), lambda i, n_ref: (i, 0)),
                pl.BlockSpec((tn, 8), lambda i, n_ref: (i, 0)),
            ],
            out_specs=pl.BlockSpec((8, 128), lambda i, n_ref: (0, 0)),
        ),
        compiler_params=pltpu.CompilerParams(
            dimension_semantics=("arbitrary",)),
        cost_estimate=cost,
    )(n_scalar, class_logits, box_regression, side)

    denom = jnp.float32(n)
    cls_loss = out[0, 0] / denom
    box_loss = out[0, 1] / denom
    return cls_loss, box_loss


def _reference(class_logits, box_regression, labels, regression_targets):
    """Pure-JAX reference mirroring the PyTorch forward (CE + SL1 path)."""
    N = class_logits.shape[0]
    logp = jax.nn.log_softmax(class_logits, axis=-1)
    ce = -jnp.mean(jnp.take_along_axis(logp, labels[:, None], axis=-1))
    pos = labels > 0
    gathered = jnp.stack(
        [jnp.take_along_axis(box_regression, (4 * labels + k)[:, None],
                             axis=-1)[:, 0] for k in range(4)], axis=-1)
    d = gathered - regression_targets
    ad = jnp.abs(d)
    sl1 = jnp.where(ad < 1.0, 0.5 * d * d, ad - 0.5)
    box_loss = jnp.sum(sl1 * pos[:, None].astype(sl1.dtype)) / N
    return ce, box_loss


if __name__ == "__main__":
    num_classes = 81      # module default
    N = 20                # small synthetic sampled-proposal count

    key = jax.random.PRNGKey(0)
    k1, k2, k3 = jax.random.split(key, 3)
    # Big inputs live in bf16 (halved HBM traffic); small ones stay f32.
    class_logits = jax.random.normal(
        k1, (N, num_classes), dtype=jnp.float32).astype(jnp.bfloat16)
    box_regression = jax.random.normal(
        k2, (N, 4 * num_classes), dtype=jnp.float32).astype(jnp.bfloat16)
    regression_targets = jax.random.normal(k3, (N, 4), dtype=jnp.float32)
    # labels: 0 = background, >0 = foreground classes (deterministic)
    labels = jnp.array([0, 3, 0, 17, 80, 0, 5, 0, 12, 0,
                        1, 0, 0, 44, 0, 7, 2, 0, 0, 9], dtype=jnp.int32)

    ref_cls, ref_box = _reference(class_logits.astype(jnp.float32),
                                  box_regression.astype(jnp.float32),
                                  labels, regression_targets)

    # Production path: default tile (single tile here, accumulator output).
    fn = jax.jit(fastrcnn_loss)
    cls_loss, box_loss = fn(class_logits, box_regression, labels,
                            regression_targets)
    jax.block_until_ready((cls_loss, box_loss))
    assert jnp.allclose(cls_loss, ref_cls, rtol=1e-4, atol=1e-4), (cls_loss, ref_cls)
    assert jnp.allclose(box_loss, ref_box, rtol=1e-4, atol=1e-4), (box_loss, ref_box)

    # Multi-tile path with a ragged, UNPADDED last block (exercises the
    # row_valid masking and the cross-tile accumulator).
    fn2 = jax.jit(functools.partial(fastrcnn_loss, tile_n=16))
    cls2, box2 = fn2(class_logits, box_regression, labels, regression_targets)
    jax.block_until_ready((cls2, box2))
    assert jnp.allclose(cls2, ref_cls, rtol=1e-4, atol=1e-4), (cls2, ref_cls)
    assert jnp.allclose(box2, ref_box, rtol=1e-4, atol=1e-4), (box2, ref_box)

    print("KERNEL_OK")
</pallas_src>

<mosaic_0001>
module attributes {stable_mosaic.version = 11 : i64} {
  func.func @_fastrcnn_loss_kernel(%arg0: i32, %arg1: memref<1xi32, #tpu.memory_space<smem>>, %arg2: memref<20x81xbf16, #tpu.memory_space<vmem>>, %arg3: memref<20x324xbf16, #tpu.memory_space<vmem>>, %arg4: memref<20x8xf32, #tpu.memory_space<vmem>>, %arg5: memref<8x128xf32, #tpu.memory_space<vmem>>) attributes {dimension_semantics = [#tpu.dimension_semantics<arbitrary>], iteration_bounds = array<i64: 1>, scalar_prefetch = 1 : i64, scratch_operands = 0 : i64, tpu.core_type = #tpu.core_type<tc>, window_params = [{transform_indices = @transform_0, window_bounds = array<i64: 20, 81>}, {transform_indices = @transform_1, window_bounds = array<i64: 20, 324>}, {transform_indices = @transform_2, window_bounds = array<i64: 20, 8>}, {pipeline_mode = #tpu.pipeline_mode<synchronous>, transform_indices = @transform_3, window_bounds = array<i64: 8, 128>}]} {
    %c0 = arith.constant 0 : index
    %0 = memref.load %arg1[%c0] : memref<1xi32, #tpu.memory_space<smem>>
    %c0_0 = arith.constant 0 : index
    %c0_1 = arith.constant 0 : index
    %1 = vector.load %arg2[%c0_0, %c0_1] : memref<20x81xbf16, #tpu.memory_space<vmem>>, vector<20x81xbf16>
    %2 = arith.extf %1 : vector<20x81xbf16> to vector<20x81xf32>
    %c0_2 = arith.constant 0 : index
    %c0_3 = arith.constant 0 : index
    %3 = vector.load %arg3[%c0_2, %c0_3] : memref<20x324xbf16, #tpu.memory_space<vmem>>, vector<20x324xbf16>
    %4 = arith.extf %3 : vector<20x324xbf16> to vector<20x324xf32>
    %c0_4 = arith.constant 0 : index
    %c0_5 = arith.constant 0 : index
    %5 = vector.load %arg4[%c0_4, %c0_5] : memref<20x8xf32, #tpu.memory_space<vmem>>, vector<20x8xf32>
    %6 = vector.extract_strided_slice %5 {offsets = [0, 0], sizes = [20, 1], strides = [1, 1]} : vector<20x8xf32> to vector<20x1xf32>
    %7 = arith.fptosi %6 : vector<20x1xf32> to vector<20x1xi32>
    %8 = vector.extract_strided_slice %5 {offsets = [0, 1], sizes = [20, 4], strides = [1, 1]} : vector<20x8xf32> to vector<20x4xf32>
    %c20_i32 = arith.constant 20 : i32
    %9 = arith.muli %arg0, %c20_i32 : i32
    %10 = tpu.iota {dimensions = array<i32: 0>} : vector<20x1xi32>
    %11 = vector.broadcast %9 : i32 to vector<20x1xi32>
    %12 = arith.addi %11, %10 : vector<20x1xi32>
    %13 = vector.broadcast %0 : i32 to vector<20x1xi32>
    %14 = arith.cmpi slt, %12, %13 : vector<20x1xi32>
    %cst = arith.constant dense<0xFF800000> : vector<20xf32>
    %15 = vector.multi_reduction <maximumf>, %2, %cst [1] : vector<20x81xf32> to vector<20xf32>
    %16 = vector.shape_cast %15 : vector<20xf32> to vector<20x1xf32>
    %17 = vector.broadcast %16 : vector<20x1xf32> to vector<20x81xf32>
    %18 = arith.subf %2, %17 : vector<20x81xf32>
    %19 = math.exp %18 : vector<20x81xf32>
    %cst_6 = arith.constant dense<0.000000e+00> : vector<20xf32>
    %20 = vector.multi_reduction <add>, %19, %cst_6 [1] : vector<20x81xf32> to vector<20xf32>
    %21 = vector.shape_cast %20 : vector<20xf32> to vector<20x1xf32>
    %22 = math.log %21 : vector<20x1xf32>
    %23 = tpu.iota {dimensions = array<i32: 1>} : vector<20x81xi32>
    %24 = vector.broadcast %7 : vector<20x1xi32> to vector<20x81xi32>
    %25 = arith.cmpi eq, %23, %24 : vector<20x81xi32>
    %cst_7 = arith.constant 0.000000e+00 : f32
    %26 = vector.broadcast %cst_7 : f32 to vector<20x81xf32>
    %27 = arith.select %25, %18, %26 : vector<20x81xi1>, vector<20x81xf32>
    %cst_8 = arith.constant dense<0.000000e+00> : vector<20xf32>
    %28 = vector.multi_reduction <add>, %27, %cst_8 [1] : vector<20x81xf32> to vector<20xf32>
    %29 = vector.shape_cast %28 : vector<20xf32> to vector<20x1xf32>
    %30 = arith.subf %22, %29 : vector<20x1xf32>
    %cst_9 = arith.constant 0.000000e+00 : f32
    %31 = vector.broadcast %cst_9 : f32 to vector<20x1xf32>
    %32 = arith.select %14, %30, %31 : vector<20x1xi1>, vector<20x1xf32>
    %33 = vector.shape_cast %32 : vector<20x1xf32> to vector<1x20x1xf32>
    %cst_10 = arith.constant dense<0.000000e+00> : vector<1xf32>
    %34 = vector.multi_reduction <add>, %33, %cst_10 [1, 2] : vector<1x20x1xf32> to vector<1xf32>
    %35 = vector.shape_cast %34 : vector<1xf32> to vector<1x1x1xf32>
    %36 = vector.extract %35[0, 0, 0] : f32 from vector<1x1x1xf32>
    %c0_i32 = arith.constant 0 : i32
    %37 = vector.broadcast %c0_i32 : i32 to vector<20x1xi32>
    %38 = arith.cmpi sgt, %7, %37 : vector<20x1xi32>
    %39 = arith.andi %38, %14 : vector<20x1xi1>
    %40 = tpu.iota {dimensions = array<i32: 1>} : vector<20x324xi32>
    %c2_i32 = arith.constant 2 : i32
    %41 = vector.broadcast %c2_i32 : i32 to vector<20x324xi32>
    %42 = arith.shrsi %40, %41 : vector<20x324xi32>
    %c3_i32 = arith.constant 3 : i32
    %43 = vector.broadcast %c3_i32 : i32 to vector<20x324xi32>
    %44 = arith.andi %40, %43 : vector<20x324xi32>
    %45 = vector.broadcast %7 : vector<20x1xi32> to vector<20x324xi32>
    %46 = arith.cmpi eq, %42, %45 : vector<20x324xi32>
    %47 = vector.broadcast %39 : vector<20x1xi1> to vector<20x324xi1>
    %48 = arith.andi %46, %47 : vector<20x324xi1>
    %cst_11 = arith.constant 0.000000e+00 : f32
    %49 = vector.broadcast %cst_11 : f32 to vector<20x324xf32>
    %50 = arith.select %48, %4, %49 : vector<20x324xi1>, vector<20x324xf32>
    %c0_i32_12 = arith.constant 0 : i32
    %51 = vector.broadcast %c0_i32_12 : i32 to vector<20x324xi32>
    %52 = arith.cmpi eq, %44, %51 : vector<20x324xi32>
    %cst_13 = arith.constant 0.000000e+00 : f32
    %53 = vector.broadcast %cst_13 : f32 to vector<20x324xf32>
    %54 = arith.select %52, %50, %53 : vector<20x324xi1>, vector<20x324xf32>
    %cst_14 = arith.constant dense<0.000000e+00> : vector<20xf32>
    %55 = vector.multi_reduction <add>, %54, %cst_14 [1] : vector<20x324xf32> to vector<20xf32>
    %56 = vector.shape_cast %55 : vector<20xf32> to vector<20x1xf32>
    %57 = vector.extract_strided_slice %8 {offsets = [0, 0], sizes = [20, 1], strides = [1, 1]} : vector<20x4xf32> to vector<20x1xf32>
    %58 = arith.subf %56, %57 : vector<20x1xf32>
    %59 = math.absf %58 : vector<20x1xf32>
    %cst_15 = arith.constant 1.000000e+00 : f32
    %60 = vector.broadcast %cst_15 : f32 to vector<20x1xf32>
    %61 = arith.cmpf olt, %59, %60 : vector<20x1xf32>
    %cst_16 = arith.constant 5.000000e-01 : f32
    %62 = vector.broadcast %cst_16 : f32 to vector<20x1xf32>
    %63 = arith.mulf %62, %58 : vector<20x1xf32>
    %64 = arith.mulf %63, %58 : vector<20x1xf32>
    %cst_17 = arith.constant 5.000000e-01 : f32
    %65 = vector.broadcast %cst_17 : f32 to vector<20x1xf32>
    %66 = arith.subf %59, %65 : vector<20x1xf32>
    %67 = arith.select %61, %64, %66 : vector<20x1xi1>, vector<20x1xf32>
    %cst_18 = arith.constant 0.000000e+00 : f32
    %68 = vector.broadcast %cst_18 : f32 to vector<20x1xf32>
    %69 = arith.select %39, %67, %68 : vector<20x1xi1>, vector<20x1xf32>
    %70 = vector.shape_cast %69 : vector<20x1xf32> to vector<1x20x1xf32>
    %cst_19 = arith.constant dense<0.000000e+00> : vector<1xf32>
    %71 = vector.multi_reduction <add>, %70, %cst_19 [1, 2] : vector<1x20x1xf32> to vector<1xf32>
    %72 = vector.shape_cast %71 : vector<1xf32> to vector<1x1x1xf32>
    %73 = vector.extract %72[0, 0, 0] : f32 from vector<1x1x1xf32>
    %cst_20 = arith.constant 0.000000e+00 : f32
    %74 = arith.addf %cst_20, %73 : f32
    %c1_i32 = arith.constant 1 : i32
    %75 = vector.broadcast %c1_i32 : i32 to vector<20x324xi32>
    %76 = arith.cmpi eq, %44, %75 : vector<20x324xi32>
    %cst_21 = arith.constant 0.000000e+00 : f32
    %77 = vector.broadcast %cst_21 : f32 to vector<20x324xf32>
    %78 = arith.select %76, %50, %77 : vector<20x324xi1>, vector<20x324xf32>
    %cst_22 = arith.constant dense<0.000000e+00> : vector<20xf32>
    %79 = vector.multi_reduction <add>, %78, %cst_22 [1] : vector<20x324xf32> to vector<20xf32>
    %80 = vector.shape_cast %79 : vector<20xf32> to vector<20x1xf32>
    %81 = vector.extract_strided_slice %8 {offsets = [0, 1], sizes = [20, 1], strides = [1, 1]} : vector<20x4xf32> to vector<20x1xf32>
    %82 = arith.subf %80, %81 : vector<20x1xf32>
    %83 = math.absf %82 : vector<20x1xf32>
    %cst_23 = arith.constant 1.000000e+00 : f32
    %84 = vector.broadcast %cst_23 : f32 to vector<20x1xf32>
    %85 = arith.cmpf olt, %83, %84 : vector<20x1xf32>
    %cst_24 = arith.constant 5.000000e-01 : f32
    %86 = vector.broadcast %cst_24 : f32 to vector<20x1xf32>
    %87 = arith.mulf %86, %82 : vector<20x1xf32>
    %88 = arith.mulf %87, %82 : vector<20x1xf32>
    %cst_25 = arith.constant 5.000000e-01 : f32
    %89 = vector.broadcast %cst_25 : f32 to vector<20x1xf32>
    %90 = arith.subf %83, %89 : vector<20x1xf32>
    %91 = arith.select %85, %88, %90 : vector<20x1xi1>, vector<20x1xf32>
    %cst_26 = arith.constant 0.000000e+00 : f32
    %92 = vector.broadcast %cst_26 : f32 to vector<20x1xf32>
    %93 = arith.select %39, %91, %92 : vector<20x1xi1>, vector<20x1xf32>
    %94 = vector.shape_cast %93 : vector<20x1xf32> to vector<1x20x1xf32>
    %cst_27 = arith.constant dense<0.000000e+00> : vector<1xf32>
    %95 = vector.multi_reduction <add>, %94, %cst_27 [1, 2] : vector<1x20x1xf32> to vector<1xf32>
    %96 = vector.shape_cast %95 : vector<1xf32> to vector<1x1x1xf32>
    %97 = vector.extract %96[0, 0, 0] : f32 from vector<1x1x1xf32>
    %98 = arith.addf %74, %97 : f32
    %c2_i32_28 = arith.constant 2 : i32
    %99 = vector.broadcast %c2_i32_28 : i32 to vector<20x324xi32>
    %100 = arith.cmpi eq, %44, %99 : vector<20x324xi32>
    %cst_29 = arith.constant 0.000000e+00 : f32
    %101 = vector.broadcast %cst_29 : f32 to vector<20x324xf32>
    %102 = arith.select %100, %50, %101 : vector<20x324xi1>, vector<20x324xf32>
    %cst_30 = arith.constant dense<0.000000e+00> : vector<20xf32>
    %103 = vector.multi_reduction <add>, %102, %cst_30 [1] : vector<20x324xf32> to vector<20xf32>
    %104 = vector.shape_cast %103 : vector<20xf32> to vector<20x1xf32>
    %105 = vector.extract_strided_slice %8 {offsets = [0, 2], sizes = [20, 1], strides = [1, 1]} : vector<20x4xf32> to vector<20x1xf32>
    %106 = arith.subf %104, %105 : vector<20x1xf32>
    %107 = math.absf %106 : vector<20x1xf32>
    %cst_31 = arith.constant 1.000000e+00 : f32
    %108 = vector.broadcast %cst_31 : f32 to vector<20x1xf32>
    %109 = arith.cmpf olt, %107, %108 : vector<20x1xf32>
    %cst_32 = arith.constant 5.000000e-01 : f32
    %110 = vector.broadcast %cst_32 : f32 to vector<20x1xf32>
    %111 = arith.mulf %110, %106 : vector<20x1xf32>
    %112 = arith.mulf %111, %106 : vector<20x1xf32>
    %cst_33 = arith.constant 5.000000e-01 : f32
    %113 = vector.broadcast %cst_33 : f32 to vector<20x1xf32>
    %114 = arith.subf %107, %113 : vector<20x1xf32>
    %115 = arith.select %109, %112, %114 : vector<20x1xi1>, vector<20x1xf32>
    %cst_34 = arith.constant 0.000000e+00 : f32
    %116 = vector.broadcast %cst_34 : f32 to vector<20x1xf32>
    %117 = arith.select %39, %115, %116 : vector<20x1xi1>, vector<20x1xf32>
    %118 = vector.shape_cast %117 : vector<20x1xf32> to vector<1x20x1xf32>
    %cst_35 = arith.constant dense<0.000000e+00> : vector<1xf32>
    %119 = vector.multi_reduction <add>, %118, %cst_35 [1, 2] : vector<1x20x1xf32> to vector<1xf32>
    %120 = vector.shape_cast %119 : vector<1xf32> to vector<1x1x1xf32>
    %121 = vector.extract %120[0, 0, 0] : f32 from vector<1x1x1xf32>
    %122 = arith.addf %98, %121 : f32
    %c3_i32_36 = arith.constant 3 : i32
    %123 = vector.broadcast %c3_i32_36 : i32 to vector<20x324xi32>
    %124 = arith.cmpi eq, %44, %123 : vector<20x324xi32>
    %cst_37 = arith.constant 0.000000e+00 : f32
    %125 = vector.broadcast %cst_37 : f32 to vector<20x324xf32>
    %126 = arith.select %124, %50, %125 : vector<20x324xi1>, vector<20x324xf32>
    %cst_38 = arith.constant dense<0.000000e+00> : vector<20xf32>
    %127 = vector.multi_reduction <add>, %126, %cst_38 [1] : vector<20x324xf32> to vector<20xf32>
    %128 = vector.shape_cast %127 : vector<20xf32> to vector<20x1xf32>
    %129 = vector.extract_strided_slice %8 {offsets = [0, 3], sizes = [20, 1], strides = [1, 1]} : vector<20x4xf32> to vector<20x1xf32>
    %130 = arith.subf %128, %129 : vector<20x1xf32>
    %131 = math.absf %130 : vector<20x1xf32>
    %cst_39 = arith.constant 1.000000e+00 : f32
    %132 = vector.broadcast %cst_39 : f32 to vector<20x1xf32>
    %133 = arith.cmpf olt, %131, %132 : vector<20x1xf32>
    %cst_40 = arith.constant 5.000000e-01 : f32
    %134 = vector.broadcast %cst_40 : f32 to vector<20x1xf32>
    %135 = arith.mulf %134, %130 : vector<20x1xf32>
    %136 = arith.mulf %135, %130 : vector<20x1xf32>
    %cst_41 = arith.constant 5.000000e-01 : f32
    %137 = vector.broadcast %cst_41 : f32 to vector<20x1xf32>
    %138 = arith.subf %131, %137 : vector<20x1xf32>
    %139 = arith.select %133, %136, %138 : vector<20x1xi1>, vector<20x1xf32>
    %cst_42 = arith.constant 0.000000e+00 : f32
    %140 = vector.broadcast %cst_42 : f32 to vector<20x1xf32>
    %141 = arith.select %39, %139, %140 : vector<20x1xi1>, vector<20x1xf32>
    %142 = vector.shape_cast %141 : vector<20x1xf32> to vector<1x20x1xf32>
    %cst_43 = arith.constant dense<0.000000e+00> : vector<1xf32>
    %143 = vector.multi_reduction <add>, %142, %cst_43 [1, 2] : vector<1x20x1xf32> to vector<1xf32>
    %144 = vector.shape_cast %143 : vector<1xf32> to vector<1x1x1xf32>
    %145 = vector.extract %144[0, 0, 0] : f32 from vector<1x1x1xf32>
    %146 = arith.addf %122, %145 : f32
    %147 = tpu.iota {dimensions = array<i32: 1>} : vector<8x128xi32>
    %c0_i32_44 = arith.constant 0 : i32
    %148 = vector.broadcast %c0_i32_44 : i32 to vector<8x128xi32>
    %149 = arith.cmpi eq, %147, %148 : vector<8x128xi32>
    %c1_i32_45 = arith.constant 1 : i32
    %150 = vector.broadcast %c1_i32_45 : i32 to vector<8x128xi32>
    %151 = arith.cmpi eq, %147, %150 : vector<8x128xi32>
    %cst_46 = arith.constant 0.000000e+00 : f32
    %152 = vector.broadcast %146 : f32 to vector<8x128xf32>
    %153 = vector.broadcast %cst_46 : f32 to vector<8x128xf32>
    %154 = arith.select %151, %152, %153 : vector<8x128xi1>, vector<8x128xf32>
    %155 = vector.broadcast %36 : f32 to vector<8x128xf32>
    %156 = arith.select %149, %155, %154 : vector<8x128xi1>, vector<8x128xf32>
    %c0_i32_47 = arith.constant 0 : i32
    %157 = arith.cmpi eq, %arg0, %c0_i32_47 : i32
    %158 = arith.extui %157 : i1 to i32
    %c0_i32_48 = arith.constant 0 : i32
    %159 = arith.cmpi ne, %158, %c0_i32_48 : i32
    scf.if %159 {
      %cst_53 = arith.constant 0.000000e+00 : f32
      %163 = vector.broadcast %cst_53 : f32 to vector<8x128xf32>
      %c0_54 = arith.constant 0 : index
      %c0_55 = arith.constant 0 : index
      %164 = vector.load %arg5[%c0_54, %c0_55] : memref<8x128xf32, #tpu.memory_space<vmem>>, vector<8x128xf32>
      tpu.vector_store %arg5[%c0_54, %c0_55], %163 {strides = array<i32>} : memref<8x128xf32, #tpu.memory_space<vmem>>, vector<8x128xf32>,
    } else {
    }
    %c0_49 = arith.constant 0 : index
    %c0_50 = arith.constant 0 : index
    %160 = vector.load %arg5[%c0_49, %c0_50] : memref<8x128xf32, #tpu.memory_space<vmem>>, vector<8x128xf32>
    %161 = arith.addf %160, %156 : vector<8x128xf32>
    %c0_51 = arith.constant 0 : index
    %c0_52 = arith.constant 0 : index
    %162 = vector.load %arg5[%c0_51, %c0_52] : memref<8x128xf32, #tpu.memory_space<vmem>>, vector<8x128xf32>
    tpu.vector_store %arg5[%c0_51, %c0_52], %161 {strides = array<i32>} : memref<8x128xf32, #tpu.memory_space<vmem>>, vector<8x128xf32>,
    return
  }
  func.func @transform_0(%arg0: i32, %arg1: memref<1xi32, #tpu.memory_space<smem>>) -> (i32, i32) {
    %c0_i32 = arith.constant 0 : i32
    %c0_i32_0 = arith.constant 0 : i32
    return %arg0, %c0_i32 : i32, i32
  }
  func.func @transform_1(%arg0: i32, %arg1: memref<1xi32, #tpu.memory_space<smem>>) -> (i32, i32) {
    %c0_i32 = arith.constant 0 : i32
    %c0_i32_0 = arith.constant 0 : i32
    return %arg0, %c0_i32 : i32, i32
  }
  func.func @transform_2(%arg0: i32, %arg1: memref<1xi32, #tpu.memory_space<smem>>) -> (i32, i32) {
    %c0_i32 = arith.constant 0 : i32
    %c0_i32_0 = arith.constant 0 : i32
    return %arg0, %c0_i32 : i32, i32
  }
  func.func @transform_3(%arg0: i32, %arg1: memref<1xi32, #tpu.memory_space<smem>>) -> (i32, i32) {
    %c0_i32 = arith.constant 0 : i32
    %c0_i32_0 = arith.constant 0 : i32
    %c0_i32_1 = arith.constant 0 : i32
    return %c0_i32, %c0_i32_0 : i32, i32
  }
}

</mosaic_0001>

<bundles_post_ra>
// kernel: fastrcnn_loss.1
= control target key start
LH: loop header
LB: loop body
LE: loop exit
PB: predicated region body
PF: predicated region fallthrough
CT: control target
= control target key end

     0   :  { %v45_v0 = vlaneseq  ;;  %v589_v1 = vmov 0   ;;  %vm1065_vm9 = vcmask 662528   ;;  %vm1064_vm10 = vcmask 658432   ;;  %s591_s8 = smov 126   ;;  %s592_s9 = smov 125   ;;  %s1056_s3 = inlined_call_operand.vmem [shape: f32[20,8], index: 3, kind: input, shape index: {}]   ;;  %s1057_s0 = inlined_call_operand.<no memory space> [shape: s32[1], index: 0, kind: input, shape index: {}]   ;;  %s1058_s1 = inlined_call_operand.vmem [shape: bf16[20,81], index: 1, kind: input, shape index: {}]   ;;  %s1059_s2 = inlined_call_operand.vmem [shape: bf16[20,324], index: 2, kind: input, shape index: {}]   ;;  %s1060_s4 = inlined_call_operand.vmem [shape: f32[8,128], index: 4, kind: output, shape index: {}]  }
   0x1   :  { %575 = vset.pattern.permute.xlu0 %v589_v1  ;;  %v622_v2 = vld [vmem:[%s1056_s3] sm:$0xff]  ;;  %v627_v3 = vstv %s1057_s0  ;;  %576 = vset.pattern.permute.xlu1 %v589_v1  ;;  %v632_v4 = vld [vmem:[%s1056_s3 + $0x8] sm:$0xff]  ;;  %v637_v5 = vld [vmem:[%s1056_s3 + $0x10] sm:$0xf]  ;;  %s593_s10 = smov 124  }
   0x2   :  { %v553_v6 = vtrunc.f32 %v622_v2  ;;  %v640_v7 = vshrl.u32 %v45_v0, 7  ;;  %v555_v8 = vtrunc.f32 %v632_v4  ;;  %v557_v9 = vtrunc.f32 %v637_v5  ;;  %v686_v21 = vld [vmem:[%s1058_s1] sm:$0xff]   ;;  %v692_v23 = vld [vmem:[%s1058_s1 + $0x8] sm:$0x3]  ;;  %v25_v39 = vld [vmem:[%s1059_s2 + $0xc] sm:$0xff] }
   0x3   :  { %v551_v22 = vunpack.c.l.bf16 %v686_v21  ;;  %v22_v25 = vunpack.c.l.bf16 %v692_v23  ;;  %v552_v27 = vunpack.c.h.bf16 %v686_v21  ;;  %v705_v29 = vand.u32 127, %v45_v0  ;;  %v23_v32 = vld [vmem:[%s1059_s2] sm:$0xff]  ;;  %v720_v35 = vld [vmem:[%s1059_s2 + $0x8] ss:$12 sps:$4 sm:$0xff]   ;;  %v745_v48 = vld [vmem:[%s1059_s2 + $0x18] sm:$0x33] }
   0x4   :  { %v554_v10 = vcvt.f32.s32 %v553_v6  ;;  %vm1063_vm0 = vcmp.lt.s32.totalorder %v640_v7, %v627_v3  ;;  %v556_v11 = vcvt.f32.s32 %v555_v8  ;;  %v647_v12 = vadd.s32 8, %v640_v7  ;;  %v753_v50 = vld [vmem:[%s1059_s2 + $0x20] sm:$0x3]  ;;  %s590_s2 = smov 127  }
   0x5   :  { %v558_v13 = vcvt.f32.s32 %v557_v9  ;;  %v650_v14 = vadd.s32 16, %v640_v7  ;;  %v58_v24 = vsel %vm1065_vm9, %v551_v22, -inf  ;;  %v65_v26 = vsel %vm1064_vm10, %v22_v25, -inf }
   0x6   :  { %95 = vperm.xlu0 %575, %v554_v10   ;;  %vm140_vm1 = vcmp.gt.s32.totalorder %v554_v10, 0  ;;  %vm141_vm2 = vcmp.gt.s32.totalorder %v556_v11, 0  ;;  %vm1062_vm3 = vcmp.lt.s32.totalorder %v647_v12, %v627_v3  ;;  %v61_v28 = vsel %vm1065_vm9, %v552_v27, -inf }
   0x7   :  { %vm657_vm4 = vmand %vm140_vm1, %vm1063_vm0  ;;  %vm142_vm6 = vcmp.gt.s32.totalorder %v558_v13, 0  ;;  %vm1061_vm7 = vcmp.lt.s32.totalorder %v650_v14, %v627_v3  ;;  %v146_v30 = vadd.s32 128, %v705_v29  ;;  %v147_v31 = vadd.s32 256, %v705_v29 }
   0x8   :  { %v163_v16 = vsel %vm657_vm4, 1, %v589_v1  ;;  %vm666_vm5 = vmand %vm141_vm2, %vm1062_vm3  ;;  %v715_v34 = vand.u32 3, %v705_v29  ;;  %v723_v36 = vshra.s32 %v705_v29, 2  ;;  %v29_v41 = vunpack.c.l.bf16 %v23_v32 }
   0x9   :  { %167 = vperm.xlu1 %576, %v163_v16   ;;  %v164_v18 = vsel %vm666_vm5, 1, %v589_v1  ;;  %vm677_vm8 = vmand %vm142_vm6, %vm1061_vm7  ;;  %v712_v33 = vand.u32 3, %v146_v30  ;;  %v725_v37 = vand.u32 3, %v147_v31  ;;  %v727_v38 = vshra.s32 %v146_v30, 2 }
   0xa   :  { %98 = vperm.xlu0 %575, %v556_v11   ;;  %v165_v20 = vsel %vm677_vm8, 1, %v589_v1  ;;  %v30_v42 = vunpack.c.h.bf16 %v23_v32  ;;  %v734_v43 = vshra.s32 %v147_v31, 2  ;;  %v31_v44 = vunpack.c.l.bf16 %v720_v35 }
   0xb   :  { %v34_v45 = vunpack.c.h.bf16 %v720_v35  ;;  %vm196_vm11 = vcmp.eq.s32.totalorder %v715_v34, 0  ;;  %vm197_vm12 = vcmp.eq.s32.totalorder %v712_v33, 0  ;;  %v32_v46 = vunpack.c.l.bf16 %v25_v39 }
   0xc   :  { %v33_v47 = vunpack.c.h.bf16 %v25_v39  ;;  %vm1066_vm2 = vcmp.eq.s32.totalorder %v715_v34, 1  ;;  %vm1067_vm10 = vcmp.eq.s32.totalorder %v715_v34, 2  ;;  %v35_v52 = vunpack.c.l.bf16 %v745_v48 }
   0xd   :  { %170 = vperm.xlu1 %576, %v164_v18   ;;  %v36_v53 = vunpack.c.h.bf16 %v745_v48  ;;  %v37_v55 = vunpack.c.l.bf16 %v753_v50 }
   0xe   :  { %101 = vperm.xlu0 %575, %v558_v13  }
  0x11   :  { %173 = vperm.xlu1 %576, %v165_v20  }
  0x2d   :  { %59 = vmax.xlane.f32.xlu0 %v58_v24 }
  0x31   :  { %66 = vmax.xlane.f32.xlu0 %v65_v26 }
  0x35   :  { %62 = vmax.xlane.f32.xlu1 %v61_v28 }
  0x85   :  { %v732_v40 = vpop.permute.xlu0 %95 }
  0x86   :  { %vm154_vm13 = vcmp.eq.s32.totalorder %v723_v36, %v732_v40  ;;  %vm155_vm15 = vcmp.eq.s32.totalorder %v727_v38, %v732_v40  ;;  %vm156_vm7 = vcmp.eq.s32.totalorder %v734_v43, %v732_v40 }
  0x88   :  { %v168_v49 = vpop.permute.xlu1 %167 }
  0x89   :  { %vm175_vm3 = vcmp.eq.s32.totalorder %v168_v49, 1  ;;  %v759_v51 = vpop.permute.xlu0 %98 }
  0x8a   :  { %vm178_vm9 = vmand %vm154_vm13, %vm175_vm3  ;;  %vm157_vm0 = vcmp.eq.s32.totalorder %v723_v36, %v759_v51  ;;  %vm158_vm13 = vcmp.eq.s32.totalorder %v727_v38, %v759_v51  ;;  %vm159_vm14 = vcmp.eq.s32.totalorder %v734_v43, %v759_v51 }
  0x8b   :  { %vm179_vm6 = vmand %vm155_vm15, %vm175_vm3  ;;  %v773_v54 = vsel %vm178_vm9, %v29_v41, 0.0 }
  0x8c   :  { %vm180_vm1 = vmand %vm156_vm7, %vm175_vm3  ;;  %v783_v56 = vsel %vm179_vm6, %v30_v42, 0.0  ;;  %v171_v57 = vpop.permute.xlu1 %170  ;;  %v199_v58 = vsel %vm196_vm11, %v773_v54, 0.0  ;;  %v282_v59 = vsel %vm1066_vm2, %v773_v54, 0.0  ;;  %vm1074_vm3 = vcmp.eq.s32.totalorder %v712_v33, 1 }
  0x8d   :  { %v793_v60 = vsel %vm180_vm1, %v31_v44, 0.0  ;;  %vm176_vm9 = vcmp.eq.s32.totalorder %v171_v57, 1  ;;  %v795_v61 = vpop.permute.xlu0 %101  ;;  %v200_v62 = vsel %vm197_vm12, %v783_v56, 0.0  ;;  %v283_v63 = vsel %vm1074_vm3, %v783_v56, 0.0 }
  0x8e   :  { %vm181_vm15 = vmand %vm157_vm0, %vm176_vm9  ;;  %vm160_vm1 = vcmp.eq.s32.totalorder %v723_v36, %v795_v61  ;;  %vm1075_vm2 = vcmp.eq.s32.totalorder %v725_v37, 0  ;;  %v362_v1 = vsel %vm1067_vm10, %v773_v54, 0.0  ;;  %v208_v8 = vadd.f32 %v200_v62, %v199_v58 }
  0x8f   :  { %v201_v0 = vsel %vm1075_vm2, %v793_v60, 0.0  ;;  %vm182_vm0 = vmand %vm158_vm13, %vm176_vm9  ;;  %v822_v6 = vsel %vm181_vm15, %v32_v46, 0.0  ;;  %vm1076_vm7 = vcmask 556032   ;;  %vm1077_vm6 = vcmp.eq.s32.totalorder %v725_v37, 1 }
  0x90   :  { %v210_v9 = vsel %vm1076_vm7, %v201_v0, 0.0  ;;  %v284_v10 = vsel %vm1077_vm6, %v793_v60, 0.0  ;;  %vm440_vm2 = vcmp.eq.s32.totalorder %v712_v33, 3  ;;  %vm183_vm3 = vmand %vm159_vm14, %vm176_vm9  ;;  %v834_v11 = vsel %vm182_vm0, %v33_v47, 0.0  ;;  %v174_v13 = vpop.permute.xlu1 %173 }
  0x91   :  { %v291_v16 = vadd.f32 %v283_v63, %v282_v59  ;;  %vm1078_vm13 = vmmov %vm1076_vm7  ;;  %v202_v20 = vsel %vm196_vm11, %v822_v6, 0.0  ;;  %v840_v24 = vsel %vm183_vm3, %v34_v45, 0.0  ;;  %vm177_vm15 = vcmp.eq.s32.totalorder %v174_v13, 1 }
  0x92   :  { %v292_v18 = vsel %vm1078_vm13, %v284_v10, 0.0  ;;  %v211_v26 = vadd.f32 %v210_v9, %v208_v8  ;;  %v203_v28 = vsel %vm197_vm12, %v834_v11, 0.0  ;;  %vm162_vm14 = vcmp.eq.s32.totalorder %v734_v43, %v795_v61  ;;  %vm184_vm9 = vmand %vm160_vm1, %vm177_vm15 }
  0x93   :  { %vm1079_vm6 = vcmp.eq.s32.totalorder %v725_v37, 0  ;;  %v214_v31 = vadd.f32 %v203_v28, %v202_v20  ;;  %vm1080_vm3 = vcmp.eq.s32.totalorder %v712_v33, 2  ;;  %vm1081_vm0 = vcmp.eq.s32.totalorder %v727_v38, %v795_v61  ;;  %vm186_vm10 = vmand %vm162_vm14, %vm177_vm15 }
  0x94   :  { %v204_v30 = vsel %vm1079_vm6, %v840_v24, 0.0  ;;  %v363_v32 = vsel %vm1080_vm3, %v783_v56, 0.0  ;;  %vm185_vm13 = vmand %vm1081_vm0, %vm177_vm15  ;;  %v193_v35 = vsel %vm184_vm9, %v35_v52, 0.0  ;;  %212 = vadd.xlane.f32.xlu0 %v211_v26  ;;  %v293_v39 = vadd.f32 %v292_v18, %v291_v16 }
  0x95   :  { %v215_v41 = vsel %vm1076_vm7, %v204_v30, 0.0  ;;  %vm1082_vm1 = vcmp.eq.s32.totalorder %v725_v37, 2  ;;  %v194_v42 = vsel %vm185_vm13, %v36_v53, 0.0  ;;  %v371_v44 = vadd.f32 %v363_v32, %v362_v1  ;;  %vm1084_vm3 = vmmov %vm1076_vm7 }
  0x96   :  { %v364_v36 = vsel %vm1082_vm1, %v793_v60, 0.0  ;;  %v216_v43 = vadd.f32 %v215_v41, %v214_v31  ;;  %vm1083_vm6 = vcmp.eq.s32.totalorder %v715_v34, 1  ;;  %v195_v46 = vsel %vm186_vm10, %v37_v55, 0.0  ;;  %vm1087_vm15 = vmmov %vm1084_vm3 }
  0x97   :  { %v285_v45 = vsel %vm1083_vm6, %v822_v6, 0.0  ;;  %v372_v38 = vsel %vm1084_vm3, %v364_v36, 0.0  ;;  %vm1085_vm9 = vcmp.eq.s32.totalorder %v712_v33, 1  ;;  %vm1086_vm7 = vcmp.eq.s32.totalorder %v725_v37, 1  ;;  %vm1090_vm0 = vmmov %vm1082_vm1 }
  0x98   :  { %v286_v47 = vsel %vm1085_vm9, %v834_v11, 0.0  ;;  %v287_v48 = vsel %vm1086_vm7, %v840_v24, 0.0  ;;  %217 = vadd.xlane.f32.xlu1 %v216_v43  ;;  %vm1088_vm14 = vcmp.eq.s32.totalorder %v715_v34, 2  ;;  %vm1089_vm10 = vcmp.eq.s32.totalorder %v712_v33, 2  ;;  %294 = vadd.xlane.f32.xlu0 %v293_v39  ;;  %vm1091_vm13 = vmmov %vm1084_vm3 }
  0x99   :  { %v296_v49 = vadd.f32 %v286_v47, %v285_v45  ;;  %v297_v50 = vsel %vm1087_vm15, %v287_v48, 0.0  ;;  %v365_v52 = vsel %vm1088_vm14, %v822_v6, 0.0  ;;  %v366_v53 = vsel %vm1089_vm10, %v834_v11, 0.0  ;;  %vm1099_vm15 = vmmov %vm1089_vm10 }
  0x9a   :  { %v367_v55 = vsel %vm1090_vm0, %v840_v24, 0.0  ;;  %v376_v57 = vadd.f32 %v366_v53, %v365_v52  ;;  %v205_v58 = vsel %vm196_vm11, %v193_v35, 0.0  ;;  %v206_v59 = vsel %vm197_vm12, %v194_v42, 0.0  ;;  %vm1097_vm12 = vmmov %vm1088_vm14 }
  0x9b   :  { %v298_v62 = vadd.f32 %v297_v50, %v296_v49  ;;  %v377_v63 = vsel %vm1091_vm13, %v367_v55, 0.0  ;;  %vm1092_vm1 = vcmp.eq.s32.totalorder %v725_v37, 0  ;;  %vm1093_vm6 = vcmask 1043456   ;;  %vm1100_vm14 = vmmov %vm1091_vm13 }
  0x9c   :  { %v207_v0 = vsel %vm1092_vm1, %v195_v46, 0.0  ;;  %v220_v1 = vsel %vm1093_vm6, %v205_v58, 0.0  ;;  %v373_v8 = vadd.f32 %v372_v38, %v371_v44  ;;  %vm1094_vm3 = vmmov %vm1093_vm6  ;;  %vm1095_vm9 = vcmp.eq.s32.totalorder %v715_v34, 3 }
  0x9d   :  { %v221_v9 = vsel %vm1094_vm3, %v206_v59, 0.0  ;;  %v442_v10 = vsel %vm1095_vm9, %v773_v54, 0.0  ;;  %299 = vadd.xlane.f32.xlu1 %v298_v62  ;;  %v443_v16 = vsel %vm440_vm2, %v783_v56, 0.0  ;;  %vm1096_vm11 = vcmp.eq.s32.totalorder %v725_v37, 3  ;;  %vm1101_vm10 = vmmov %vm1090_vm0 }
  0x9e   :  { %v222_v13 = vadd.f32 %v221_v9, %v220_v1  ;;  %v444_v18 = vsel %vm1096_vm11, %v793_v60, 0.0  ;;  %v368_v20 = vsel %vm1097_vm12, %v193_v35, 0.0  ;;  %374 = vadd.xlane.f32.xlu0 %v373_v8  ;;  %v378_v26 = vadd.f32 %v377_v63, %v376_v57  ;;  %vm1102_vm0 = vmmov %vm1094_vm3 }
  0x9f   :  { %vm1098_vm7 = vcmask 551936   ;;  %v451_v30 = vadd.f32 %v443_v16, %v442_v10  ;;  %v369_v54 = vsel %vm1099_vm15, %v194_v42, 0.0  ;;  %v452_v31 = vsel %vm1100_vm14, %v444_v18, 0.0  ;;  %vm1103_vm13 = vmmov %vm1102_vm0 }
  0xa0   :  { %v224_v28 = vsel %vm1098_vm7, %v207_v0, 0.0  ;;  %v370_v56 = vsel %vm1101_vm10, %v195_v46, 0.0  ;;  %v381_v32 = vsel %vm1102_vm0, %v368_v20, 0.0  ;;  %v382_v60 = vsel %vm1103_vm13, %v369_v54, 0.0  ;;  %vm1106_vm3 = vmmov %vm1102_vm0 }
  0xa1   :  { %v225_v39 = vadd.f32 %v224_v28, %v222_v13  ;;  %v383_v41 = vadd.f32 %v382_v60, %v381_v32  ;;  %vm1104_vm1 = vcmp.eq.s32.totalorder %v715_v34, 1  ;;  %vm1105_vm6 = vcmp.eq.s32.totalorder %v712_v33, 1  ;;  %379 = vadd.xlane.f32.xlu1 %v378_v26  ;;  %vm1107_vm9 = vmmov %vm1102_vm0 }
  0xa2   :  { %v288_v36 = vsel %vm1104_vm1, %v193_v35, 0.0  ;;  %v289_v43 = vsel %vm1105_vm6, %v194_v42, 0.0  ;;  %vm1108_vm11 = vcmp.eq.s32.totalorder %v715_v34, 3  ;;  %v453_v47 = vadd.f32 %v452_v31, %v451_v30  ;;  %vm1109_vm12 = vmmov %vm1098_vm7 }
  0xa3   :  { %v301_v44 = vsel %vm1106_vm3, %v288_v36, 0.0  ;;  %v302_v45 = vsel %vm1107_vm9, %v289_v43, 0.0  ;;  %v445_v38 = vsel %vm1108_vm11, %v822_v6, 0.0  ;;  %226 = vadd.xlane.f32.xlu0 %v225_v39  ;;  %v384_v48 = vsel %vm1109_vm12, %v370_v56, 0.0  ;;  %vm1112_vm14 = vmmov %vm1108_vm11 }
  0xa4   :  { %vm1110_vm7 = vcmp.eq.s32.totalorder %v725_v37, 1  ;;  %v446_v50 = vsel %vm440_vm2, %v834_v11, 0.0  ;;  %v303_v52 = vadd.f32 %v302_v45, %v301_v44  ;;  %vm1111_vm15 = vcmp.eq.s32.totalorder %v725_v37, 3  ;;  %vm1113_vm10 = vmmov %vm1102_vm0 }
  0xa5   :  { %v290_v49 = vsel %vm1110_vm7, %v195_v46, 0.0  ;;  %v447_v53 = vsel %vm1111_vm15, %v840_v24, 0.0  ;;  %v448_v55 = vsel %vm1112_vm14, %v193_v35, 0.0  ;;  %v449_v6 = vsel %vm440_vm2, %v194_v42, 0.0  ;;  %454 = vadd.xlane.f32.xlu1 %v453_v47  ;;  %vm1115_vm13 = vmmov %vm1106_vm3 }
  0xa6   :  { %v385_v57 = vadd.f32 %v384_v48, %v383_v41  ;;  %v456_v58 = vadd.f32 %v446_v50, %v445_v38  ;;  %v461_v59 = vsel %vm1113_vm10, %v448_v55, 0.0  ;;  %vm1114_vm0 = vcmask 556032   ;;  %vm1116_vm1 = vmmov %vm1109_vm12 }
  0xa7   :  { %v457_v62 = vsel %vm1114_vm0, %v447_v53, 0.0  ;;  %v462_v11 = vsel %vm1115_vm13, %v449_v6, 0.0  ;;  %v304_v63 = vsel %vm1116_vm1, %v290_v49, 0.0  ;;  %vm1117_vm6 = vmmov %vm1111_vm15  ;;  %vm103_vm3 = vcmp.eq.s32.totalorder %v705_v29, %v732_v40 }
  0xa8   :  { %386 = vadd.xlane.f32.xlu0 %v385_v57  ;;  %v305_v0 = vadd.f32 %v304_v63, %v303_v52  ;;  %v450_v34 = vsel %vm1117_vm6, %v195_v46, 0.0  ;;  %v463_v24 = vadd.f32 %v462_v11, %v461_v59  ;;  %v458_v35 = vadd.f32 %v457_v62, %v456_v58  ;;  %vm1118_vm2 = vmmov %vm1116_vm1 }
  0xa9   :  { %v464_v33 = vsel %vm1118_vm2, %v450_v34, 0.0  ;;  %vm1119_vm9 = vcmask 662528   ;;  %vm105_vm11 = vcmp.eq.s32.totalorder %v705_v29, %v795_v61  ;;  %vm1120_vm12 = vcmask 658432  }
  0xaa   :  { %306 = vadd.xlane.f32.xlu1 %v305_v0  ;;  %v465_v42 = vadd.f32 %v464_v33, %v463_v24  ;;  %vm104_vm7 = vcmp.eq.s32.totalorder %v705_v29, %v759_v51  ;;  %vm1121_vm15 = vmmov %vm1119_vm9 }
  0xab   :  { %vm1122_vm14 = vmmov %vm1119_vm9 }
  0xac   :  { %459 = vadd.xlane.f32.xlu0 %v458_v35  ;;  %vm1123_vm10 = vmmov %vm1120_vm12 }
  0xad   :  { %vm1124_vm0 = vmmov %vm1119_vm9 }
  0xae   :  { %466 = vadd.xlane.f32.xlu1 %v465_v42 }
  0xba   :  { %v60_v1 = vpop.xlane.xlu0 %59 }
  0xbb   :  { %v68_v8 = vsub.f32 %v551_v22, %v60_v1 }
  0xbd   :  { %v71_v9 = vmul.f32 1.442695, %v68_v8  ;;  %v106_v10 = vsel %vm103_vm3, %v68_v8, 0.0 }
  0xbe   :  { %v67_v13 = vpop.xlane.xlu0 %66  ;;  %v109_v37 = vsel %vm1119_vm9, %v106_v10, 0.0 }
  0xbf   :  { %577 = vpow2.f32 %v71_v9  ;;  %v70_v46 = vsub.f32 %v22_v25, %v67_v13  ;;  %110 = vadd.xlane.f32.xlu1 %v109_v37 }
  0xc1   :  { %v75_v16 = vmul.f32 1.442695, %v70_v46  ;;  %v108_v18 = vsel %vm105_vm11, %v70_v46, 0.0 }
  0xc2   :  { %v63_v20 = vpop.xlane.xlu1 %62  ;;  %v115_v22 = vsel %vm1120_vm12, %v108_v18, 0.0 }
  0xc3   :  { %579 = vpow2.f32 %v75_v16  ;;  %v69_v40 = vsub.f32 %v552_v27, %v63_v20  ;;  %116 = vadd.xlane.f32.xlu1 %v115_v22 }
  0xc5   :  { %v73_v26 = vmul.f32 1.442695, %v69_v40  ;;  %v107_v23 = vsel %vm104_vm7, %v69_v40, 0.0 }
  0xc6   :  { %v112_v25 = vsel %vm1121_vm15, %v107_v23, 0.0 }
  0xc7   :  { %581 = vpow2.f32 %v73_v26  ;;  %113 = vadd.xlane.f32.xlu0 %v112_v25 }
  0xc9   :  { %v578_v61 = vpop.eup %577 }
  0xca   :  { %v77_v28 = vsel %vm1122_vm14, %v578_v61, 0.0 }
  0xcb   :  { %78 = vadd.xlane.f32.xlu0 %v77_v28 }
  0xcd   :  { %v580_v30 = vpop.eup %579 }
  0xce   :  { %v83_v54 = vsel %vm1123_vm10, %v580_v30, 0.0 }
  0xcf   :  { %84 = vadd.xlane.f32.xlu0 %v83_v54 }
  0xd1   :  { %v582_v21 = vpop.eup %581 }
  0xd2   :  { %v80_v27 = vsel %vm1124_vm0, %v582_v21, 0.0  ;;  %vm1133_vm0 = vcmp.lt.s32.totalorder %v640_v7, %v627_v3 }
  0xd3   :  { %81 = vadd.xlane.f32.xlu1 %v80_v27 }
 0x121   :  { %v213_v31 = vpop.xlane.xlu0 %212 }
 0x122   :  { %v228_v51 = vsub.f32 %v213_v31, %v622_v2 }
 0x124   :  { %v231_v56 = vand.u32 2147483647, %v228_v51  ;;  %v237_v32 = vmul.f32 0.5, %v228_v51 }
 0x125   :  { %v218_v60 = vpop.xlane.xlu1 %217  ;;  %v295_v39 = vpop.xlane.xlu0 %294 }
 0x126   :  { %v229_v41 = vsub.f32 %v218_v60, %v632_v4  ;;  %v240_v36 = vmul.f32 %v237_v32, %v228_v51  ;;  %v308_v43 = vsub.f32 %v295_v39, %v622_v2  ;;  %vm234_vm13 = vcmp.lt.f32.partialorder %v231_v56, 1.0 }
 0x127   :  { %v537_v44 = vadd.f32 -0.5, %v231_v56 }
 0x128   :  { %v232_v45 = vand.u32 2147483647, %v229_v41  ;;  %v238_v38 = vmul.f32 0.5, %v229_v41  ;;  %v311_v47 = vand.u32 2147483647, %v308_v43  ;;  %v317_v48 = vmul.f32 0.5, %v308_v43 }
 0x129   :  { %v246_v49 = vsel %vm234_vm13, %v240_v36, %v537_v44  ;;  %vm124_vm13 = vcmask 7168  }
 0x12a   :  { %v300_v50 = vpop.xlane.xlu1 %299  ;;  %v241_v52 = vmul.f32 %v238_v38, %v229_v41  ;;  %252 = vrot.lane.b32.xlu0 %v246_v49, %s590_s2  ;;  %vm235_vm1 = vcmp.lt.f32.partialorder %v232_v45, 1.0  ;;  %v538_v6 = vadd.f32 -0.5, %v232_v45  ;;  %v320_v57 = vmul.f32 %v317_v48, %v308_v43 }
 0x12b   :  { %v375_v53 = vpop.xlane.xlu0 %374  ;;  %v309_v55 = vsub.f32 %v300_v50, %v632_v4  ;;  %v540_v59 = vadd.f32 -0.5, %v311_v47  ;;  %vm964_vm6 = vcmp.lt.f32.partialorder %v311_v47, 1.0 }
 0x12c   :  { %v388_v58 = vsub.f32 %v375_v53, %v622_v2  ;;  %v247_v63 = vsel %vm235_vm1, %v241_v52, %v538_v6  ;;  %vm1134_vm1 = vcmp.lt.s32.totalorder %v647_v12, %v627_v3 }
 0x12d   :  { %v312_v62 = vand.u32 2147483647, %v309_v55  ;;  %v318_v11 = vmul.f32 0.5, %v309_v55  ;;  %254 = vrot.lane.b32.xlu1 %v247_v63, %s590_s2  ;;  %v326_v13 = vsel %vm964_vm6, %v320_v57, %v540_v59  ;;  %vm1135_vm6 = vcmp.lt.s32.totalorder %v650_v14, %v627_v3 }
 0x12e   :  { %v391_v34 = vand.u32 2147483647, %v388_v58  ;;  %v397_v24 = vmul.f32 0.5, %v388_v58  ;;  %v380_v35 = vpop.xlane.xlu1 %379 }
 0x12f   :  { %v321_v33 = vmul.f32 %v318_v11, %v309_v55  ;;  %v389_v1 = vsub.f32 %v380_v35, %v632_v4  ;;  %vm315_vm2 = vcmp.lt.f32.partialorder %v312_v62, 1.0  ;;  %v541_v8 = vadd.f32 -0.5, %v312_v62 }
 0x130   :  { %v227_v42 = vpop.xlane.xlu0 %226  ;;  %v400_v9 = vmul.f32 %v397_v24, %v388_v58  ;;  %v543_v37 = vadd.f32 -0.5, %v391_v34  ;;  %vm973_vm3 = vcmp.lt.f32.partialorder %v391_v34, 1.0 }
 0x131   :  { %v230_v10 = vsub.f32 %v227_v42, %v637_v5  ;;  %v392_v46 = vand.u32 2147483647, %v389_v1  ;;  %v398_v16 = vmul.f32 0.5, %v389_v1  ;;  %v327_v18 = vsel %vm315_vm2, %v321_v33, %v541_v8  ;;  %332 = vrot.lane.b32.xlu1 %v326_v13, %s591_s8 }
 0x132   :  { %334 = vrot.lane.b32.xlu0 %v327_v18, %s591_s8  ;;  %v455_v26 = vpop.xlane.xlu1 %454  ;;  %v406_v21 = vsel %vm973_vm3, %v400_v9, %v543_v37  ;;  %vm128_vm2 = vcmask 3072  }
 0x133   :  { %v233_v22 = vand.u32 2147483647, %v230_v10  ;;  %v239_v40 = vmul.f32 0.5, %v230_v10  ;;  %v401_v23 = vmul.f32 %v398_v16, %v389_v1  ;;  %v468_v61 = vsub.f32 %v455_v26, %v622_v2 }
 0x134   :  { %vm395_vm9 = vcmp.lt.f32.partialorder %v392_v46, 1.0  ;;  %v544_v28 = vadd.f32 -0.5, %v392_v46 }
 0x135   :  { %v387_v25 = vpop.xlane.xlu0 %386  ;;  %v242_v30 = vmul.f32 %v239_v40, %v230_v10  ;;  %v539_v27 = vadd.f32 -0.5, %v233_v22  ;;  %v471_v31 = vand.u32 2147483647, %v468_v61  ;;  %v477_v51 = vmul.f32 0.5, %v468_v61  ;;  %412 = vrot.lane.b32.xlu1 %v406_v21, %s592_s9 }
 0x136   :  { %v390_v54 = vsub.f32 %v387_v25, %v637_v5  ;;  %v407_v56 = vsel %vm395_vm9, %v401_v23, %v544_v28  ;;  %vm983_vm11 = vcmp.lt.f32.partialorder %v233_v22, 1.0 }
 0x137   :  { %414 = vrot.lane.b32.xlu0 %v407_v56, %s592_s9  ;;  %v307_v2 = vpop.xlane.xlu1 %306  ;;  %v480_v41 = vmul.f32 %v477_v51, %v468_v61  ;;  %vm474_vm12 = vcmp.lt.f32.partialorder %v471_v31, 1.0  ;;  %v546_v44 = vadd.f32 -0.5, %v471_v31  ;;  %v248_v47 = vsel %vm983_vm11, %v242_v30, %v539_v27 }
 0x138   :  { %v393_v60 = vand.u32 2147483647, %v390_v54  ;;  %v399_v39 = vmul.f32 0.5, %v390_v54  ;;  %v310_v43 = vsub.f32 %v307_v2, %v637_v5 }
 0x139   :  { %v460_v36 = vpop.xlane.xlu0 %459  ;;  %v486_v52 = vsel %vm474_vm12, %v480_v41, %v546_v44  ;;  %256 = vrot.lane.b32.xlu1 %v248_v47, %s590_s2 }
 0x13a   :  { %v402_v45 = vmul.f32 %v399_v39, %v390_v54  ;;  %v469_v38 = vsub.f32 %v460_v36, %v632_v4  ;;  %v545_v48 = vadd.f32 -0.5, %v393_v60  ;;  %v313_v49 = vand.u32 2147483647, %v310_v43 }
 0x13b   :  { %v319_v50 = vmul.f32 0.5, %v310_v43  ;;  %vm993_vm7 = vcmp.lt.f32.partialorder %v393_v60, 1.0  ;;  %492 = vrot.lane.b32.xlu0 %v486_v52, %s593_s10  ;;  %v467_v57 = vpop.xlane.xlu1 %466 }
 0x13c   :  { %v472_v55 = vand.u32 2147483647, %v469_v38  ;;  %v478_v6 = vmul.f32 0.5, %v469_v38  ;;  %v470_v4 = vsub.f32 %v467_v57, %v637_v5  ;;  %vm316_vm15 = vcmp.lt.f32.partialorder %v313_v49, 1.0 }
 0x13d   :  { %v322_v58 = vmul.f32 %v319_v50, %v310_v43  ;;  %v542_v59 = vadd.f32 -0.5, %v313_v49  ;;  %v408_v11 = vsel %vm993_vm7, %v402_v45, %v545_v48 }
 0x13e   :  { %v481_v62 = vmul.f32 %v478_v6, %v469_v38  ;;  %v473_v63 = vand.u32 2147483647, %v470_v4  ;;  %v479_v0 = vmul.f32 0.5, %v470_v4  ;;  %v547_v24 = vadd.f32 -0.5, %v472_v55  ;;  %416 = vrot.lane.b32.xlu1 %v408_v11, %s592_s9 }
 0x13f   :  { %v328_v34 = vsel %vm316_vm15, %v322_v58, %v542_v59  ;;  %vm475_vm14 = vcmp.lt.f32.partialorder %v472_v55, 1.0 }
 0x140   :  { %336 = vrot.lane.b32.xlu0 %v328_v34, %s591_s8  ;;  %v482_v35 = vmul.f32 %v479_v0, %v470_v4  ;;  %vm476_vm10 = vcmp.lt.f32.partialorder %v473_v63, 1.0  ;;  %v548_v33 = vadd.f32 -0.5, %v473_v63  ;;  %v487_v42 = vsel %vm475_vm14, %v481_v62, %v547_v24 }
 0x142   :  { %v488_v5 = vsel %vm476_vm10, %v482_v35, %v548_v33  ;;  %494 = vrot.lane.b32.xlu1 %v487_v42, %s593_s10 }
 0x144   :  { %496 = vrot.lane.b32.xlu0 %v488_v5, %s593_s10 }
 0x14c   :  { %v111_v8 = vpop.xlane.xlu1 %110 }
 0x150   :  { %v117_v10 = vpop.xlane.xlu1 %116 }
 0x154   :  { %v114_v1 = vpop.xlane.xlu0 %113 }
 0x158   :  { %v79_v9 = vpop.xlane.xlu0 %78 }
 0x159   :  { %583 = vlog2.f32 %v79_v9 }
 0x15c   :  { %v85_v13 = vpop.xlane.xlu0 %84 }
 0x15d   :  { %585 = vlog2.f32 %v85_v13 }
 0x160   :  { %v82_v37 = vpop.xlane.xlu1 %81 }
 0x161   :  { %587 = vlog2.f32 %v82_v37 }
 0x163   :  { %v584_v46 = vpop.eup %583 }
 0x164   :  { %v87_v16 = vmul.f32 0.6931472, %v584_v46 }
 0x166   :  { %v118_v22 = vsub.f32 %v87_v16, %v111_v8 }
 0x167   :  { %v586_v18 = vpop.eup %585 }
 0x168   :  { %v91_v20 = vmul.f32 0.6931472, %v586_v18  ;;  %v121_v61 = vsel %vm1133_vm0, %v118_v22, 0.0 }
 0x169   :  { %v125_v54 = vsel %vm124_vm13, %v121_v61, 0.0 }
 0x16a   :  { %v120_v26 = vsub.f32 %v91_v20, %v117_v10 }
 0x16b   :  { %v588_v40 = vpop.eup %587 }
 0x16c   :  { %v89_v23 = vmul.f32 0.6931472, %v588_v40  ;;  %v123_v30 = vsel %vm1135_vm6, %v120_v26, 0.0 }
 0x16d   :  { %v129_v31 = vsel %vm128_vm2, %v123_v30, 0.0 }
 0x16e   :  { %v119_v25 = vsub.f32 %v89_v23, %v114_v1 }
 0x170   :  { %v122_v28 = vsel %vm1134_vm1, %v119_v25, 0.0 }
 0x171   :  { %v126_v21 = vsel %vm124_vm13, %v122_v28, 0.0 }
 0x172   :  { %v127_v27 = vadd.f32 %v126_v21, %v125_v54 }
 0x174   :  { %v130_v51 = vadd.f32 %v129_v31, %v127_v27 }
 0x176   :  { %131 = vadd.xlane.f32.xlu1 %v130_v51 }
 0x19c   :  { %v253_v7 = vpop.permute.xlu0 %252 }
 0x19d   :  { %v261_v14 = vsel %vm657_vm4, %v253_v7, 0.0 }
 0x19e   :  { %v264_v45 = vsel %vm124_vm13, %v261_v14, 0.0 }
 0x19f   :  { %v255_v56 = vpop.permute.xlu1 %254 }
 0x1a0   :  { %v262_v12 = vsel %vm666_vm5, %v255_v56, 0.0 }
 0x1a1   :  { %v265_v2 = vsel %vm124_vm13, %v262_v12, 0.0 }
 0x1a2   :  { %v266_v48 = vadd.f32 %v265_v2, %v264_v45 }
 0x1a3   :  { %v333_v60 = vpop.permute.xlu1 %332 }
 0x1a4   :  { %v335_v32 = vpop.permute.xlu0 %334  ;;  %v341_v36 = vsel %vm657_vm4, %v333_v60, 0.0 }
 0x1a5   :  { %v342_v41 = vsel %vm666_vm5, %v335_v32, 0.0  ;;  %v344_v52 = vsel %vm124_vm13, %v341_v36, 0.0 }
 0x1a6   :  { %v345_v49 = vsel %vm124_vm13, %v342_v41, 0.0 }
 0x1a7   :  { %v413_v3 = vpop.permute.xlu1 %412  ;;  %v346_v59 = vadd.f32 %v345_v49, %v344_v52 }
 0x1a8   :  { %v421_v44 = vsel %vm657_vm4, %v413_v3, 0.0 }
 0x1a9   :  { %v415_v39 = vpop.permute.xlu0 %414  ;;  %v424_v55 = vsel %vm124_vm13, %v421_v44, 0.0 }
 0x1aa   :  { %v422_v43 = vsel %vm666_vm5, %v415_v39, 0.0 }
 0x1ab   :  { %v257_v47 = vpop.permute.xlu1 %256  ;;  %v425_v53 = vsel %vm124_vm13, %v422_v43, 0.0 }
 0x1ac   :  { %v263_v50 = vsel %vm677_vm8, %v257_v47, 0.0  ;;  %v426_v62 = vadd.f32 %v425_v53, %v424_v55 }
 0x1ad   :  { %v493_v38 = vpop.permute.xlu0 %492  ;;  %v267_v6 = vsel %vm128_vm2, %v263_v50, 0.0 }
 0x1ae   :  { %v268_v57 = vadd.f32 %v267_v6, %v266_v48  ;;  %v501_v24 = vsel %vm657_vm4, %v493_v38, 0.0  ;;  %vm520_vm4 = vcmp.eq.s32.totalorder %v705_v29, 1 }
 0x1af   :  { %v504_v9 = vsel %vm124_vm13, %v501_v24, 0.0 }
 0x1b0   :  { %v417_v4 = vpop.permute.xlu1 %416  ;;  %269 = vadd.xlane.f32.xlu0 %v268_v57 }
 0x1b1   :  { %v423_v63 = vsel %vm677_vm8, %v417_v4, 0.0 }
 0x1b2   :  { %v337_v58 = vpop.permute.xlu0 %336  ;;  %v427_v34 = vsel %vm128_vm2, %v423_v63, 0.0 }
 0x1b3   :  { %v343_v11 = vsel %vm677_vm8, %v337_v58, 0.0  ;;  %v428_v33 = vadd.f32 %v427_v34, %v426_v62 }
 0x1b4   :  { %v347_v0 = vsel %vm128_vm2, %v343_v11, 0.0  ;;  %v495_v5 = vpop.permute.xlu1 %494 }
 0x1b5   :  { %v348_v35 = vadd.f32 %v347_v0, %v346_v59  ;;  %v502_v8 = vsel %vm666_vm5, %v495_v5, 0.0  ;;  %429 = vadd.xlane.f32.xlu1 %v428_v33  ;;  %vm519_vm5 = vcmp.eq.s32.totalorder %v705_v29, 0 }
 0x1b6   :  { %v497_v42 = vpop.permute.xlu0 %496  ;;  %v505_v10 = vsel %vm124_vm13, %v502_v8, 0.0 }
 0x1b7   :  { %v503_v1 = vsel %vm677_vm8, %v497_v42, 0.0  ;;  %349 = vadd.xlane.f32.xlu0 %v348_v35  ;;  %v506_v13 = vadd.f32 %v505_v10, %v504_v9 }
 0x1b8   :  { %v507_v15 = vsel %vm128_vm2, %v503_v1, 0.0 }
 0x1b9   :  { %v508_v37 = vadd.f32 %v507_v15, %v506_v13 }
 0x1bb   :  { %509 = vadd.xlane.f32.xlu0 %v508_v37 }
 0x203   :  { %v132_v46 = vpop.xlane.xlu1 %131 }
 0x204   :  { %v133_v16 = vrot.slane %v132_v46, 4 }
 0x206   :  { %v134_v18 = vadd.f32 %v133_v16, %v132_v46 }
 0x208   :  { %v135_v20 = vrot.slane %v134_v18, 2 }
 0x20a   :  { %v136_v19 = vadd.f32 %v135_v20, %v134_v18 }
 0x20c   :  { %v137_v22 = vrot.slane %v136_v19, 1 }
 0x20e   :  { %v138_v40 = vadd.f32 %v137_v22, %v136_v19 }
 0x210   :  { %559 = vpush %v138_v40 }
 0x23d   :  { %v270_v17 = vpop.xlane.xlu0 %269 }
 0x23e   :  { %v271_v26 = vrot.slane %v270_v17, 4 }
 0x240   :  { %v272_v23 = vadd.f32 %v271_v26, %v270_v17 }
 0x241   :  { %s560_s11 = spop %559 }
 0x242   :  { %v430_v61 = vpop.xlane.xlu1 %429  ;;  %v273_v28 = vrot.slane %v272_v23, 2  ;;  %v523_v49 = vstv %s560_s11 }
 0x243   :  { %v431_v54 = vrot.slane %v430_v61, 4 }
 0x244   :  { %v350_v25 = vpop.xlane.xlu0 %349  ;;  %v274_v31 = vadd.f32 %v273_v28, %v272_v23 }
 0x245   :  { %v351_v30 = vrot.slane %v350_v25, 4  ;;  %v432_v27 = vadd.f32 %v431_v54, %v430_v61 }
 0x246   :  { %v275_v56 = vrot.slane %v274_v31, 1 }
 0x247   :  { %v352_v21 = vadd.f32 %v351_v30, %v350_v25  ;;  %v433_v7 = vrot.slane %v432_v27, 2 }
 0x248   :  { %v510_v32 = vpop.xlane.xlu0 %509  ;;  %v276_v39 = vadd.f32 %v275_v56, %v274_v31 }
 0x249   :  { %v353_v51 = vrot.slane %v352_v21, 2  ;;  %v434_v60 = vadd.f32 %v433_v7, %v432_v27  ;;  %v511_v12 = vrot.slane %v510_v32, 4 }
 0x24a   :  { %561 = vpush %v276_v39 }
 0x24b   :  { %v354_v3 = vadd.f32 %v353_v51, %v352_v21  ;;  %v512_v14 = vadd.f32 %v511_v12, %v510_v32  ;;  %v435_v41 = vrot.slane %v434_v60, 1 }
 0x24d   :  { %v355_v2 = vrot.slane %v354_v3, 1  ;;  %v513_v36 = vrot.slane %v512_v14, 2  ;;  %v436_v44 = vadd.f32 %v435_v41, %v434_v60 }
 0x24f   :  { %v356_v43 = vadd.f32 %v355_v2, %v354_v3  ;;  %v514_v45 = vadd.f32 %v513_v36, %v512_v14 }
 0x251   :  { %563 = vpush %v356_v43  ;;  %v515_v38 = vrot.slane %v514_v45, 1 }
 0x252   :  { %565 = vpush %v436_v44 }
 0x253   :  { %v516_v47 = vadd.f32 %v515_v38, %v514_v45 }
 0x255   :  { %567 = vpush %v516_v47 }
 0x27b   :  { %s562_s12 = spop %561 }
 0x282   :  { %s564_s13 = spop %563 }
 0x283   :  { %s358_s14 = sadd.f32 %s564_s13, %s562_s12  ;;  %s566_s15 = spop %565 }
 0x285   :  { %s438_s16 = sadd.f32 %s566_s15, %s358_s14 }
 0x286   :  { %s568_s17 = spop %567 }
 0x287   :  { %s518_s18 = sadd.f32 %s568_s17, %s438_s16 }
 0x289   :  { %v521_v48 = vstv %s518_s18 }
 0x28a   :  { %v522_v50 = vsel %vm520_vm4, %v521_v48, 0.0 }
 0x28b   :  { %v524_v52 = vsel %vm519_vm5, %v523_v49, %v522_v50 }
 0x28c   :  { %532 = vst [vmem:[%s1060_s4] sm:$0xff] %v524_v52 }

</bundles_post_ra>
